<compile_context>
chip_gen: v7x
topology: tpu7x:2x2x1
jax: 0.10.0
libtpu: 0.0.40
codegen_flags: <defaults>
</compile_context>

<pallas_src>
import functools

import jax
import jax.numpy as jnp
from jax.experimental import pallas as pl
from jax.experimental.pallas import tpu as pltpu


# ----------------------------------------------------------------------------
# Kernel: fused  sigmoid(relu(z @ W1^T + b1) @ W2^T + b2)
# for one (batch_tile, n_tile) output block.
# ----------------------------------------------------------------------------
def decodeur_kernel(z_ref, w1_ref, b1_ref, w2_ref, b2_ref, out_ref):
    # First matmul: bf16 operands, f32 accumulation on the MXU.
    h = jnp.dot(z_ref[...], w1_ref[...], preferred_element_type=jnp.float32)
    # Bias + ReLU in f32 on the VPU.
    h = jnp.maximum(h + b1_ref[...], 0.0)
    # Second matmul (operand-only bf16 cast; h stays VMEM/vreg resident).
    o = jnp.dot(h.astype(jnp.bfloat16), w2_ref[...],
                preferred_element_type=jnp.float32)
    o = o + b2_ref[...]
    out_ref[...] = jax.nn.sigmoid(o).astype(out_ref.dtype)


# ----------------------------------------------------------------------------
# Helpers
# ----------------------------------------------------------------------------
def _round_up(x, m):
    return ((x + m - 1) // m) * m


def _vmem_budget_bytes():
    """~85% of this generation's VMEM, capped at 100 MiB. 64 MiB fallback."""
    try:
        cap = pltpu.get_tpu_info().vmem_capacity_bytes
        return int(min(cap * 0.85, 100 * 1024 * 1024))
    except Exception:  # pragma: no cover - conservative fallback
        return 64 * 1024 * 1024


_BATCH_TILE_CANDIDATES = (512, 384, 256, 128, 64, 32, 16, 8)


def _choose_batch_tile(b_p8, max_tile):
    """Largest tile <= max_tile; keep >= 2 batch tiles when the batch allows
    it so v7x's two TensorCores both get work on the 'parallel' axis."""
    if b_p8 <= 16:
        return b_p8                                   # tiny batch: one step
    cap = min(max_tile, max(8, (b_p8 // 2) // 8 * 8))  # guarantees grid >= 2
    for cand in _BATCH_TILE_CANDIDATES:
        if cand <= cap and b_p8 % cand == 0:
            return cand
    # No exact divisor among the candidates: accept a padded final tile.
    return min(cap, 256)


def _plan_tiles(batch, dim_red, dim_inter_p, dim_sortie_p, out_itemsize,
                batch_tile=None):
    """Pick (batch_tile, n_tile) so the per-step working set fits VMEM."""
    budget = _vmem_budget_bytes()
    b_p8 = _round_up(max(batch, 1), 8)

    # W1^T + b1 are grid-invariant and single-buffered (Buffered(1)).
    w1_bytes = dim_red * dim_inter_p * 2 + dim_inter_p * 4

    n128 = dim_sortie_p // 128
    n_tile_cands = [d * 128 for d in range(n128, 0, -1) if n128 % d == 0]

    for n_tile in n_tile_cands:
        # Full-width W2^T is grid-invariant -> 1 buffer; N-tiled -> 2 buffers.
        n_bufs = 1 if n_tile == dim_sortie_p else 2
        w2_bytes = n_bufs * (dim_inter_p * n_tile * 2 + n_tile * 4)
        rem = budget - w1_bytes - w2_bytes
        if rem <= 0:
            continue
        # Per-batch-row cost: double-buffered z + out tiles, plus the h and
        # pre-sigmoid f32 intermediates the compiler keeps in VMEM.
        per_row = (2 * (dim_red * 2 + n_tile * out_itemsize)
                   + dim_inter_p * 6 + n_tile * 4)
        max_bt = (rem // per_row) // 8 * 8
        if max_bt < 8:
            continue
        if batch_tile is not None:
            bt = max(8, min(int(batch_tile), max_bt, b_p8))
            bt = (bt // 8) * 8
        else:
            bt = _choose_batch_tile(b_p8, min(512, max_bt))
        bt = min(bt, b_p8)
        return bt, n_tile, budget

    # Pathological fallback: smallest legal tiles.
    return min(8, b_p8), 128, budget


@functools.lru_cache(maxsize=None)
def _build_call(bt, n_tile, b_pad, dim_red, dim_inter_p, dim_sortie_p,
                out_dtype_name, vmem_limit):
    out_dtype = jnp.dtype(out_dtype_name)
    grid = (b_pad // bt, dim_sortie_p // n_tile)

    # Grid-invariant operands: single buffer (no wasted double-buffer VMEM).
    inv = {"pipeline_mode": pl.Buffered(1)}
    # W2^T / b2 are only invariant if the N axis is not tiled.
    w2_kwargs = inv if grid[1] == 1 else {}

    in_specs = [
        pl.BlockSpec((bt, dim_red), lambda i, j: (i, 0)),                    # z
        pl.BlockSpec((dim_red, dim_inter_p), lambda i, j: (0, 0), **inv),    # W1^T
        pl.BlockSpec((1, dim_inter_p), lambda i, j: (0, 0), **inv),          # b1
        pl.BlockSpec((dim_inter_p, n_tile), lambda i, j: (0, j), **w2_kwargs),  # W2^T
        pl.BlockSpec((1, n_tile), lambda i, j: (0, j), **w2_kwargs),         # b2
    ]
    out_spec = pl.BlockSpec((bt, n_tile), lambda i, j: (i, j))

    cost = pl.CostEstimate(
        flops=2 * b_pad * (dim_red * dim_inter_p + dim_inter_p * dim_sortie_p),
        transcendentals=b_pad * dim_sortie_p,                # sigmoid -> EUP exp
        bytes_accessed=(b_pad * dim_red * 2
                        + dim_red * dim_inter_p * 2
                        + dim_inter_p * dim_sortie_p * 2
                        + dim_inter_p * 4 + dim_sortie_p * 4
                        + b_pad * dim_sortie_p * out_dtype.itemsize),
    )

    return pl.pallas_call(
        decodeur_kernel,
        out_shape=jax.ShapeDtypeStruct((b_pad, dim_sortie_p), out_dtype),
        grid_spec=pl.GridSpec(
            grid=grid,
            in_specs=in_specs,
            out_specs=out_spec,
        ),
        compiler_params=pltpu.CompilerParams(
            dimension_semantics=("parallel", "parallel"),
            vmem_limit_bytes=int(vmem_limit),
        ),
        cost_estimate=cost,
    )


# ----------------------------------------------------------------------------
# One-time parameter preparation (hoisted out of the per-call path)
# ----------------------------------------------------------------------------
def prepare_decodeur_params(w1, b1, w2, b2):
    """w1: (dimInter, dimRed), b1: (dimInter,), w2: (dimSortie, dimInter),
       b2: (dimSortie,)  -- PyTorch nn.Linear layout.
       Returns weights transposed to (in, out), padded to 128-multiples on the
       hidden/output dims, cast to bf16 (weights) / f32 row-vectors (biases)."""
    dim_inter, dim_red = w1.shape
    dim_sortie = w2.shape[0]
    dim_inter_p = _round_up(dim_inter, 128)
    dim_sortie_p = _round_up(dim_sortie, 128)

    w1_t = jnp.pad(w1.T.astype(jnp.bfloat16),
                   ((0, 0), (0, dim_inter_p - dim_inter)))
    b1_2d = jnp.pad(b1.astype(jnp.float32),
                    (0, dim_inter_p - dim_inter))[None, :]
    w2_t = jnp.pad(w2.T.astype(jnp.bfloat16),
                   ((0, dim_inter_p - dim_inter),
                    (0, dim_sortie_p - dim_sortie)))
    b2_2d = jnp.pad(b2.astype(jnp.float32),
                    (0, dim_sortie_p - dim_sortie))[None, :]

    return {
        "w1_t": w1_t, "b1": b1_2d, "w2_t": w2_t, "b2": b2_2d,
        "dim_red": int(dim_red), "dim_inter_p": int(dim_inter_p),
        "dim_sortie": int(dim_sortie), "dim_sortie_p": int(dim_sortie_p),
    }


# ----------------------------------------------------------------------------
# Forward pass
# ----------------------------------------------------------------------------
def decodeur_forward(z, params, *, out_dtype=jnp.float32, batch_tile=None):
    """z: (B, dimRed) f32. Returns sigmoid(relu(z @ W1^T + b1) @ W2^T + b2),
       shape (B, dimSortie), dtype `out_dtype`."""
    B, dim_red = z.shape
    assert dim_red == params["dim_red"], "latent dim mismatch"
    dim_inter_p = params["dim_inter_p"]
    dim_sortie = params["dim_sortie"]
    dim_sortie_p = params["dim_sortie_p"]
    out_dtype = jnp.dtype(out_dtype)

    bt, n_tile, budget = _plan_tiles(B, dim_red, dim_inter_p, dim_sortie_p,
                                     out_dtype.itemsize, batch_tile)
    b_pad = _round_up(_round_up(B, 8), bt)

    z_p = z.astype(jnp.bfloat16)
    if b_pad != B:
        z_p = jnp.pad(z_p, ((0, b_pad - B), (0, 0)))

    call = _build_call(bt, n_tile, b_pad, dim_red, dim_inter_p, dim_sortie_p,
                       out_dtype.name, budget)
    out_p = call(z_p, params["w1_t"], params["b1"], params["w2_t"], params["b2"])

    # Skip the extra HBM pass when no padding was actually added.
    if b_pad != B or dim_sortie_p != dim_sortie:
        out_p = out_p[:B, :dim_sortie]
    return out_p


def init_params(key, dim_red, dim_inter, dim_sortie, dtype=jnp.float32):
    """Deterministic PyTorch-style Linear init: U(-1/sqrt(fan_in), 1/sqrt(fan_in))."""
    k1, k2, k3, k4 = jax.random.split(key, 4)
    bound1 = 1.0 / jnp.sqrt(dim_red)
    bound2 = 1.0 / jnp.sqrt(dim_inter)
    w1 = jax.random.uniform(k1, (dim_inter, dim_red), dtype, -bound1, bound1)
    b1 = jax.random.uniform(k2, (dim_inter,), dtype, -bound1, bound1)
    w2 = jax.random.uniform(k3, (dim_sortie, dim_inter), dtype, -bound2, bound2)
    b2 = jax.random.uniform(k4, (dim_sortie,), dtype, -bound2, bound2)
    return w1, b1, w2, b2


if __name__ == "__main__":
    # Small shapes consistent with a VAE decoder: latent -> hidden -> flat output.
    B, dimRed, dimInter, dimSortie = 16, 32, 64, 128

    key = jax.random.PRNGKey(0)
    kz, kp = jax.random.split(key)
    z = jax.random.normal(kz, (B, dimRed), jnp.float32)
    w1, b1, w2, b2 = init_params(kp, dimRed, dimInter, dimSortie)

    # One-time weight prep (transpose / pad / bf16 cast hoisted out of forward).
    params = prepare_decodeur_params(w1, b1, w2, b2)

    out = decodeur_forward(z, params)
    out = jax.block_until_ready(out)

    # Reference check in plain JAX (f32); bf16 MXU operands -> loosened tolerance.
    ref = jax.nn.sigmoid(jnp.maximum(z @ w1.T + b1, 0.0) @ w2.T + b2)
    assert out.shape == (B, dimSortie)
    assert jnp.allclose(out, ref, atol=2e-2, rtol=2e-2), "mismatch vs reference"

    # Optional bf16-output path (halves output writeback for mem-bound sizes).
    out_bf16 = jax.block_until_ready(
        decodeur_forward(z, params, out_dtype=jnp.bfloat16))
    assert out_bf16.shape == (B, dimSortie)
    assert jnp.allclose(out_bf16.astype(jnp.float32), ref, atol=4e-2, rtol=4e-2)

    print("KERNEL_OK")
</pallas_src>

<mosaic_0001>
module attributes {stable_mosaic.version = 11 : i64} {
  func.func @decodeur_kernel(%arg0: i32, %arg1: i32, %arg2: memref<16x32xbf16, #tpu.memory_space<vmem>>, %arg3: memref<32x128xbf16, #tpu.memory_space<vmem>>, %arg4: memref<1x128xf32, #tpu.memory_space<vmem>>, %arg5: memref<128x128xbf16, #tpu.memory_space<vmem>>, %arg6: memref<1x128xf32, #tpu.memory_space<vmem>>, %arg7: memref<16x128xf32, #tpu.memory_space<vmem>>) attributes {dimension_semantics = [#tpu.dimension_semantics<parallel>, #tpu.dimension_semantics<parallel>], iteration_bounds = array<i64: 1, 1>, scalar_prefetch = 0 : i64, scratch_operands = 0 : i64, tpu.core_type = #tpu.core_type<tc>, window_params = [{transform_indices = @transform_0, window_bounds = array<i64: 16, 32>}, {pipeline_mode = #tpu.pipeline_mode<synchronous>, transform_indices = @transform_1, window_bounds = array<i64: 32, 128>}, {pipeline_mode = #tpu.pipeline_mode<synchronous>, transform_indices = @transform_2, window_bounds = array<i64: 1, 128>}, {pipeline_mode = #tpu.pipeline_mode<synchronous>, transform_indices = @transform_3, window_bounds = array<i64: 128, 128>}, {pipeline_mode = #tpu.pipeline_mode<synchronous>, transform_indices = @transform_4, window_bounds = array<i64: 1, 128>}, {transform_indices = @transform_5, window_bounds = array<i64: 16, 128>}]} {
    %c0 = arith.constant 0 : index
    %c0_0 = arith.constant 0 : index
    %0 = vector.load %arg2[%c0, %c0_0] : memref<16x32xbf16, #tpu.memory_space<vmem>>, vector<16x32xbf16>
    %c0_1 = arith.constant 0 : index
    %c0_2 = arith.constant 0 : index
    %1 = vector.load %arg3[%c0_1, %c0_2] : memref<32x128xbf16, #tpu.memory_space<vmem>>, vector<32x128xbf16>
    %cst = arith.constant dense<0.000000e+00> : vector<16x128xf32>
    %2 = tpu.matmul %0, %1, %cst {dimension_numbers = #tpu.dot_dimension_numbers<[1], [0], [0], [1], [0, 0, 1, 1], [], []>} : vector<16x32xbf16>, vector<32x128xbf16>, vector<16x128xf32> -> vector<16x128xf32>
    %c0_3 = arith.constant 0 : index
    %c0_4 = arith.constant 0 : index
    %3 = vector.load %arg4[%c0_3, %c0_4] : memref<1x128xf32, #tpu.memory_space<vmem>>, vector<1x128xf32>
    %4 = vector.broadcast %3 : vector<1x128xf32> to vector<16x128xf32>
    %5 = arith.addf %2, %4 : vector<16x128xf32>
    %cst_5 = arith.constant 0.000000e+00 : f32
    %6 = vector.broadcast %cst_5 : f32 to vector<16x128xf32>
    %7 = arith.maximumf %5, %6 : vector<16x128xf32>
    %8 = arith.truncf %7 : vector<16x128xf32> to vector<16x128xbf16>
    %c0_6 = arith.constant 0 : index
    %c0_7 = arith.constant 0 : index
    %9 = vector.load %arg5[%c0_6, %c0_7] : memref<128x128xbf16, #tpu.memory_space<vmem>>, vector<128x128xbf16>
    %cst_8 = arith.constant dense<0.000000e+00> : vector<16x128xf32>
    %10 = tpu.matmul %8, %9, %cst_8 {dimension_numbers = #tpu.dot_dimension_numbers<[1], [0], [0], [1], [0, 0, 1, 1], [], []>} : vector<16x128xbf16>, vector<128x128xbf16>, vector<16x128xf32> -> vector<16x128xf32>
    %c0_9 = arith.constant 0 : index
    %c0_10 = arith.constant 0 : index
    %11 = vector.load %arg6[%c0_9, %c0_10] : memref<1x128xf32, #tpu.memory_space<vmem>>, vector<1x128xf32>
    %12 = vector.broadcast %11 : vector<1x128xf32> to vector<16x128xf32>
    %13 = arith.addf %10, %12 : vector<16x128xf32>
    %14 = arith.negf %13 : vector<16x128xf32>
    %15 = math.exp %14 : vector<16x128xf32>
    %cst_11 = arith.constant 1.000000e+00 : f32
    %16 = vector.broadcast %cst_11 : f32 to vector<16x128xf32>
    %17 = arith.addf %16, %15 : vector<16x128xf32>
    %18 = arith.divf %16, %17 : vector<16x128xf32>
    %c0_12 = arith.constant 0 : index
    %c0_13 = arith.constant 0 : index
    %19 = vector.load %arg7[%c0_12, %c0_13] : memref<16x128xf32, #tpu.memory_space<vmem>>, vector<16x128xf32>
    tpu.vector_store %arg7[%c0_12, %c0_13], %18 {strides = array<i32>} : memref<16x128xf32, #tpu.memory_space<vmem>>, vector<16x128xf32>,
    return
  }
  func.func @transform_0(%arg0: i32, %arg1: i32) -> (i32, i32) {
    %c0_i32 = arith.constant 0 : i32
    %c0_i32_0 = arith.constant 0 : i32
    return %arg0, %c0_i32 : i32, i32
  }
  func.func @transform_1(%arg0: i32, %arg1: i32) -> (i32, i32) {
    %c0_i32 = arith.constant 0 : i32
    %c0_i32_0 = arith.constant 0 : i32
    %c0_i32_1 = arith.constant 0 : i32
    return %c0_i32, %c0_i32_0 : i32, i32
  }
  func.func @transform_2(%arg0: i32, %arg1: i32) -> (i32, i32) {
    %c0_i32 = arith.constant 0 : i32
    %c0_i32_0 = arith.constant 0 : i32
    %c0_i32_1 = arith.constant 0 : i32
    return %c0_i32, %c0_i32_0 : i32, i32
  }
  func.func @transform_3(%arg0: i32, %arg1: i32) -> (i32, i32) {
    %c0_i32 = arith.constant 0 : i32
    %c0_i32_0 = arith.constant 0 : i32
    return %c0_i32, %arg1 : i32, i32
  }
  func.func @transform_4(%arg0: i32, %arg1: i32) -> (i32, i32) {
    %c0_i32 = arith.constant 0 : i32
    %c0_i32_0 = arith.constant 0 : i32
    return %c0_i32, %arg1 : i32, i32
  }
  func.func @transform_5(%arg0: i32, %arg1: i32) -> (i32, i32) {
    %c0_i32 = arith.constant 0 : i32
    return %arg0, %arg1 : i32, i32
  }
}

</mosaic_0001>

<bundles_post_ra>
// kernel: tpu_custom_call.1
= control target key start
LH: loop header
LB: loop body
LE: loop exit
PB: predicated region body
PF: predicated region fallthrough
CT: control target
= control target key end

     0   :  { %10 = vsyncpa [#allocation3], 0  ;;  %s666_s0 = inlined_call_operand.hbm [shape: bf16[16,32], index: 0, kind: input, shape index: {}]   ;;  %s667_s1 = inlined_call_operand.hbm [shape: bf16[32,128], index: 1, kind: input, shape index: {}]   ;;  %s668_s2 = inlined_call_operand.hbm [shape: f32[1,128], index: 2, kind: input, shape index: {}]   ;;  %s669_s3 = inlined_call_operand.hbm [shape: bf16[128,128], index: 3, kind: input, shape index: {}]   ;;  %s670_s4 = inlined_call_operand.hbm [shape: f32[1,128], index: 4, kind: input, shape index: {}]   ;;  %s671_s5 = inlined_call_operand.hbm [shape: f32[16,128], index: 5, kind: output, shape index: {}]  }
   0x1   :  { %11 = vsyncpa [#allocation6], 0 }
   0x2   :  { %12 = vsyncpa [#allocation9], 0 }
   0x3   :  { %13 = vsyncpa [#allocation4], 0  ;;  %s536_s18 = smov [#allocation5]   ;;  %s537_s20 = smov [#allocation8]  }
   0x4   :  { %s31_s19 = sshll.u32 %s536_s18, 4  ;;  %s53_s21 = sshll.u32 %s537_s20, 4  ;;  %s32_s19 = int_to_ptr.vmem [resolvable:$true] %s31_s19  ;;  %s578_s21 = int_to_ptr.vmem [resolvable:$true] %s53_s21 }
   0x5   :  { %s396_s24 = scalar_lea.hbm %s667_s1, 256 }
   0x6   :  { %p397_p0 = scmp.ne.s32.totalorder %s667_s1, %s396_s24  ;;  %p400_p1 = scmp.lt.u32.totalorder %s396_s24, %s667_s1 }
   0x8   :  { %p402_p2 = pnand %p400_p1, %p397_p0 }
   0xa   :  { %405 = shalt.err (!%p402_p2)
}
   0xb   :  { %s406_s29 = scalar_lea.vmem %s32_s19, 256  ;;  %p411_p4 = scmp.lt.s32.totalorder %s32_s19, %s32_s19 }
   0xc   :  { %p407_p3 = scmp.ne.s32.totalorder %s32_s19, %s406_s29  ;;  %p412_p5 = scmp.lt.s32.totalorder %s406_s29, %s406_s29 }
   0xe   :  { %p413_p6 = por %p412_p5, %p411_p4 }
  0x10   :  { %p414_p7 = pnand %p413_p6, %p407_p3 }
  0x12   :  { %417 = shalt.err (!%p414_p7)
}
  0x13   :  { %s538_s30 = smov 64   ;;  %s539_s6 = smov 4  }
  0x14   :  { %37 = dma.hbm_to_vmem [thread:$0]  %s667_s1, 256, %s32_s19, [#allocation6], %s538_s30, %s538_s30, %s539_s6  }
  0x15   :  { %s418_s11 = scalar_lea.hbm %s669_s3, 1024 }
  0x16   :  { %p419_p8 = scmp.ne.s32.totalorder %s669_s3, %s418_s11  ;;  %p422_p9 = scmp.lt.u32.totalorder %s418_s11, %s669_s3 }
  0x18   :  { %p424_p10 = pnand %p422_p9, %p419_p8 }
  0x1a   :  { %427 = shalt.err (!%p424_p10)
}
  0x1b   :  { %s428_s16 = scalar_lea.vmem %s578_s21, 1024  ;;  %p433_p12 = scmp.lt.s32.totalorder %s578_s21, %s578_s21 }
  0x1c   :  { %p429_p11 = scmp.ne.s32.totalorder %s578_s21, %s428_s16  ;;  %p434_p13 = scmp.lt.s32.totalorder %s428_s16, %s428_s16 }
  0x1e   :  { %p435_p0 = por %p434_p13, %p433_p12 }
  0x20   :  { %p436_p1 = pnand %p435_p0, %p429_p11 }
  0x22   :  { %439 = shalt.err (!%p436_p1)
}
  0x23   :  { %59 = dma.hbm_to_vmem [thread:$0]  %s669_s3, 1024, %s578_s21, [#allocation9], %s538_s30, %s538_s30, %s539_s6  }
  0x24   :  { %s540_s18 = smov [#allocation2]   ;;  %s541_s20 = smov [#allocation7]  }
  0x25   :  { %s19_s19 = sshll.u32 %s540_s18, 4  ;;  %s44_s22 = sshll.u32 %s541_s20, 4  ;;  %s20_s19 = int_to_ptr.vmem [resolvable:$true] %s19_s19  ;;  %s45_s22 = int_to_ptr.vmem [resolvable:$true] %s44_s22 }
  0x26   :  { %s440_s25 = scalar_lea.hbm %s666_s0, 128 }
  0x27   :  { %p441_p2 = scmp.ne.s32.totalorder %s666_s0, %s440_s25  ;;  %p444_p3 = scmp.lt.u32.totalorder %s440_s25, %s666_s0 }
  0x29   :  { %p446_p4 = pnand %p444_p3, %p441_p2 }
  0x2b   :  { %449 = shalt.err (!%p446_p4)
}
  0x2c   :  { %s450_s3 = scalar_lea.vmem %s20_s19, 128  ;;  %p455_p6 = scmp.lt.s32.totalorder %s20_s19, %s20_s19 }
  0x2d   :  { %p451_p5 = scmp.ne.s32.totalorder %s20_s19, %s450_s3  ;;  %p456_p7 = scmp.lt.s32.totalorder %s450_s3, %s450_s3 }
  0x2f   :  { %p457_p8 = por %p456_p7, %p455_p6 }
  0x31   :  { %p458_p9 = pnand %p457_p8, %p451_p5 }
  0x33   :  { %461 = shalt.err (!%p458_p9)
}
  0x34   :  { %25 = dma.hbm_to_vmem [thread:$0]  %s666_s0, 128, %s20_s19, [#allocation3], %s538_s30, %s538_s30, %s539_s6  }
  0x35   :  { %s462_s10 = scalar_lea.hbm %s668_s2, 16 }
  0x36   :  { %p463_p10 = scmp.ne.s32.totalorder %s668_s2, %s462_s10  ;;  %p466_p11 = scmp.lt.u32.totalorder %s462_s10, %s668_s2 }
  0x38   :  { %p468_p12 = pnand %p466_p11, %p463_p10 }
  0x3a   :  { %471 = shalt.err (!%p468_p12)
}
  0x3b   :  { %s472_s15 = scalar_lea.vmem %s45_s22, 16  ;;  %s476_s16 = scalar_lea.vmem %s45_s22, 32 }
  0x3c   :  { %p473_p13 = scmp.ne.s32.totalorder %s45_s22, %s472_s15  ;;  %p477_p0 = scmp.lt.s32.totalorder %s45_s22, %s45_s22 }
  0x3d   :  { %p478_p1 = scmp.lt.s32.totalorder %s476_s16, %s472_s15 }
  0x3f   :  { %p479_p2 = por %p478_p1, %p477_p0 }
  0x41   :  { %p480_p3 = pnand %p479_p2, %p473_p13 }
  0x43   :  { %483 = shalt.err (!%p480_p3)
}
  0x44   :  { %47 = dma.hbm_to_vmem [thread:$0]  %s668_s2, 16, %s45_s22, [#allocation6]  }
  0x45   :  { %s542_s6 = smov [#allocation10]   ;;  %s484_s19 = scalar_lea.hbm %s670_s4, 16 }
  0x46   :  { %s66_s1 = sshll.u32 %s542_s6, 4  ;;  %p485_p4 = scmp.ne.s32.totalorder %s670_s4, %s484_s19  ;;  %s67_s1 = int_to_ptr.vmem [resolvable:$true] %s66_s1 }
  0x47   :  { %p488_p5 = scmp.lt.u32.totalorder %s484_s19, %s670_s4 }
  0x49   :  { %p490_p6 = pnand %p488_p5, %p485_p4 }
  0x4b   :  { %493 = shalt.err (!%p490_p6)
}
  0x4c   :  { %s494_s26 = scalar_lea.vmem %s67_s1, 16  ;;  %s498_s2 = scalar_lea.vmem %s67_s1, 32 }
  0x4d   :  { %p495_p7 = scmp.ne.s32.totalorder %s67_s1, %s494_s26  ;;  %p499_p8 = scmp.lt.s32.totalorder %s67_s1, %s67_s1 }
  0x4e   :  { %p500_p9 = scmp.lt.s32.totalorder %s498_s2, %s494_s26 }
  0x50   :  { %p501_p10 = por %p500_p9, %p499_p8 }
  0x52   :  { %p502_p11 = pnand %p501_p10, %p495_p7 }
  0x54   :  { %505 = shalt.err (!%p502_p11)
}
  0x55   :  { %69 = dma.hbm_to_vmem [thread:$0]  %s670_s4, 16, %s67_s1, [#allocation9]  }
  0x56   :  { %528 = dma.done.wait [#allocation3], 128  }
  0x57   :  { %529 = vsyncadd [#allocation3], 4294967168 }
  0x58   :  { %530 = dma.done.wait [#allocation6], 272  }
  0x59   :  { %531 = vsyncadd [#allocation6], 4294967024 }
  0x5a   :  { %532 = dma.done.wait [#allocation9], 1040  }
  0x5b   :  { %533 = vsyncadd [#allocation9], 4294966256  ;;  %v543_v0 = vmov 0.0   ;;  %vm544_vm0 = vmmov 0   ;;  %v377_v1 = vld [vmem:[#allocation5] sm:$0xff]   ;;  %v378_v2 = vld [vmem:[#allocation5 + $0x8] sm:$0xff]  }
  0x5c   :  { %337 = vmatprep.subr.bf16.mxu0 %v543_v0  ;;  %341 = vmatprep.mubr.msk.bf16.mxu0 %vm544_vm0, %v543_v0  ;;  %v380_v3 = vld [vmem:[#allocation8] sm:$0xff]   ;;  %v381_v5 = vld [vmem:[#allocation8 + $0x8] sm:$0xff]   ;;  %vm116_vm1 = vcmask 261120   ;;  %v382_v6 = vld [vmem:[#allocation8 + $0x10] sm:$0xff]   ;;  %s545_s4 = smov [#allocation11]  }
  0x5d   :  { %345 = vmatprep.subr.bf16.mxu1 %v543_v0  ;;  %361 = vmatprep.mubr.msk.bf16.mxu1 %vm544_vm0, %v543_v0  ;;  %v379_v4 = vld [vmem:[#allocation2] sm:$0xff]   ;;  %v383_v7 = vld [vmem:[#allocation8 + $0x18] sm:$0xff]   ;;  %v386_v10 = vld [vmem:[#allocation8 + $0x30] sm:$0xff]   ;;  %s295_s28 = sshll.u32 %s545_s4, 4  ;;  %s296_s28 = int_to_ptr.vmem [resolvable:$true] %s295_s28 }
  0x5e   :  { %338 = vmatpush3.bf16.msra.mxu0 %v377_v1  ;;  %346 = vmatpush3.bf16.msra.mxu1 %v380_v3  ;;  %v384_v8 = vld [vmem:[#allocation8 + $0x20] sm:$0xff]   ;;  %v385_v9 = vld [vmem:[#allocation8 + $0x28] sm:$0xff]   ;;  %v387_v11 = vld [vmem:[#allocation8 + $0x38] sm:$0xff]   ;;  %s506_s29 = scalar_lea.vmem %s296_s28, 256  ;;  %p511_p13 = scmp.lt.s32.totalorder %s296_s28, %s296_s28 }
  0x5f   :  { %339 = vmatprep.subr.bf16.mxu0 %v543_v0  ;;  %347 = vmatprep.subr.bf16.mxu1 %v543_v0  ;;  %v309_v12 = vld [vmem:[#allocation7] ss:$0 sm:$0xff]  ;;  %v314_v22 = vld [vmem:[#allocation10] ss:$0 sm:$0xff]  ;;  %p507_p12 = scmp.ne.s32.totalorder %s296_s28, %s506_s29  ;;  %p512_p0 = scmp.lt.s32.totalorder %s506_s29, %s506_s29 }
  0x61   :  { %p513_p1 = por %p512_p0, %p511_p13 }
  0x62   :  { %340 = vmatpush3.bf16.msra.mxu0 %v378_v2  ;;  %348 = vmatpush3.bf16.msra.mxu1 %v381_v5 }
  0x63   :  { %349 = vmatprep.subr.bf16.mxu1 %v543_v0  ;;  %p514_p2 = pnand %p513_p1, %p507_p12 }
  0x65   :  { %342 = vmatmul.mubr.msk.bf16.vlgmr.msra.gmra.mrb[0].mxu0 %vm116_vm1, %v379_v4 }
  0x66   :  { %350 = vmatpush3.bf16.msra.mxu1 %v382_v6 }
  0x67   :  { %351 = vmatprep.subr.bf16.mxu1 %v543_v0 }
  0x6a   :  { %352 = vmatpush3.bf16.msra.mxu1 %v383_v7 }
  0x6b   :  { %353 = vmatprep.subr.bf16.mxu1 %v543_v0 }
  0x6e   :  { %354 = vmatpush3.bf16.msra.mxu1 %v384_v8 }
  0x6f   :  { %355 = vmatprep.subr.bf16.mxu1 %v543_v0 }
  0x72   :  { %356 = vmatpush3.bf16.msra.mxu1 %v385_v9 }
  0x73   :  { %357 = vmatprep.subr.bf16.mxu1 %v543_v0 }
  0x76   :  { %358 = vmatpush3.bf16.msra.mxu1 %v386_v10 }
  0x77   :  { %359 = vmatprep.subr.bf16.mxu1 %v543_v0 }
  0x7a   :  { %360 = vmatpush3.bf16.msra.mxu1 %v387_v11 }
 0x138   :  { %v154_v13 = vpop.f32.mrb[0].mxu0 }
 0x139   :  { %v155_v14 = vadd.f32 %v309_v12, %v154_v13  ;;  %v343_v15 = vpop.f32.mrb[1].mxu0 }
 0x13a   :  { %v157_v16 = vpop.f32.mrb[2].mxu0 }
 0x13b   :  { %v158_v17 = vadd.f32 %v309_v12, %v157_v16  ;;  %v344_v18 = vpop.f32.mrb[3].mxu0  ;;  %v161_v19 = vmax.f32 %v155_v14, 0.0 }
 0x13d   :  { %v162_v20 = vmax.f32 %v158_v17, 0.0 }
 0x13f   :  { %v163_v21 = vpack.c.bf16 %v162_v20, %v161_v19 }
 0x141   :  { %362 = vmatmul.mubr.bf16.vlgmr.msra.gmra.mrb[0].mxu1 %v163_v21 }
 0x214   :  { %v269_v23 = vpop.f32.mrb[0].mxu1 }
 0x215   :  { %v270_v24 = vadd.f32 %v314_v22, %v269_v23  ;;  %v363_v25 = vpop.f32.mrb[1].mxu1 }
 0x216   :  { %v272_v26 = vpop.f32.mrb[2].mxu1 }
 0x217   :  { %v323_v27 = vmul.f32 -1.442695, %v270_v24  ;;  %v273_v28 = vadd.f32 %v314_v22, %v272_v26  ;;  %v364_v29 = vpop.f32.mrb[3].mxu1 }
 0x219   :  { %388 = vpow2.f32 %v323_v27  ;;  %v324_v30 = vmul.f32 -1.442695, %v273_v28 }
 0x21b   :  { %390 = vpow2.f32 %v324_v30 }
 0x223   :  { %v389_v31 = vpop.eup %388 }
 0x224   :  { %v282_v32 = vadd.f32 1.0, %v389_v31 }
 0x225   :  { %v391_v33 = vpop.eup %390 }
 0x226   :  { %392 = vrcp.f32 %v282_v32  ;;  %v283_v34 = vadd.f32 1.0, %v391_v33 }
 0x228   :  { %394 = vrcp.f32 %v283_v34 }
 0x230   :  { %v393_v35 = vpop.eup %392 }
 0x231   :  { %288 = vst [vmem:[#allocation11] sm:$0xff] %v393_v35 }
 0x232   :  { %v395_v36 = vpop.eup %394 }
 0x233   :  { %289 = vst [vmem:[#allocation11 + $0x8] sm:$0xff] %v395_v36 }
 0x234   :  { %517 = shalt.err (!%p514_p2)
}
 0x235   :  { %s518_s7 = scalar_lea.hbm %s671_s5, 256 }
 0x236   :  { %p519_p3 = scmp.ne.s32.totalorder %s671_s5, %s518_s7  ;;  %p522_p4 = scmp.lt.u32.totalorder %s518_s7, %s671_s5 }
 0x238   :  { %p524_p5 = pnand %p522_p4, %p519_p3 }
 0x23a   :  { %527 = shalt.err (!%p524_p5)
}
 0x23b   :  { %s546_s12 = smov 128   ;;  %s547_s13 = smov 8  }
 0x23c   :  { %301 = dma.vmem_to_hbm [thread:$0]  %s296_s28, 256, %s671_s5, [#allocation4], %s546_s12, %s546_s12, %s547_s13  }
 0x23d   :  { %534 = dma.done.wait [#allocation4], 256  }
 0x23e   :  { %535 = vsyncadd [#allocation4], 4294967040 }
 0x23f   :  { %305 = vsyncpa [#allocation3], 1 }
 0x240   :  { %306 = vsyncpa [#allocation6], 1 }
 0x241   :  { %307 = vsyncpa [#allocation9], 1 }
 0x242   :  { %308 = vsyncpa [#allocation4], 1 }

</bundles_post_ra>
